<compile_context>
chip_gen: v6e
topology: v6e:2x2x1
jax: 0.10.0
libtpu: 0.0.40
codegen_flags: <defaults>
</compile_context>

<pallas_src>
import jax
import jax.numpy as jnp
from jax.experimental import pallas as pl
from jax.experimental.pallas import tpu as pltpu


def _round_up(x, m):
    return ((x + m - 1) // m) * m


# ----------------------------- fused Pallas kernel ---------------------------

def fused_gcn_kernel(a_ref, x_ref, w_ref, b_ref, p_ref, wl_ref, bl_ref,
                     o_ref, h_ref):
    """Fused: L x (GCNConv + ReLU) -> mean pool -> Linear.

    a_ref : (Np, Np)  bf16 symmetric-normalized adjacency (zero-padded)
    x_ref : (Np, D)   bf16 node features (zero-padded to D lanes)
    w_ref : (L, D, D) bf16 stacked conv weights (zero-padded)
    b_ref : (L, 1, D) f32  stacked conv biases (zero-padded)
    p_ref : (Gp, Np)  bf16 mean-pooling matrix (zero-padded)
    wl_ref: (D, 128)  bf16 final linear weight (real column 0, rest zero)
    bl_ref: (1, 128)  f32  final linear bias
    o_ref : (Gp, 128) f32  lane-dense output slab (real result in column 0)
    h_ref : (Np, D)   bf16 VMEM scratch holding the running activation
    """
    num_layers = w_ref.shape[0]

    # Uniform A @ (H @ W) for every layer (F_pad == H_pad after padding).
    h_in = x_ref[...]
    for l in range(num_layers):                      # static unroll, L is small
        hw = jnp.dot(h_in, w_ref[l],
                     preferred_element_type=jnp.float32).astype(jnp.bfloat16)
        act = jnp.dot(a_ref[...], hw,
                      preferred_element_type=jnp.float32) + b_ref[l]
        h_ref[...] = jnp.maximum(act, 0.0).astype(jnp.bfloat16)
        h_in = h_ref[...]

    # global_mean_pool as P @ H, then final Linear; lane-dense output store.
    pooled = jnp.dot(p_ref[...], h_ref[...],
                     preferred_element_type=jnp.float32).astype(jnp.bfloat16)
    o_ref[...] = (
        jnp.dot(pooled, wl_ref[...], preferred_element_type=jnp.float32)
        + bl_ref[...]
    )


def _cost_estimate(n_pad, d_pad, g_pad, num_layers):
    flops = (2 * num_layers * (n_pad * d_pad * d_pad + n_pad * n_pad * d_pad)
             + 2 * g_pad * n_pad * d_pad
             + 2 * g_pad * d_pad * 128)
    bytes_accessed = (n_pad * n_pad * 2                     # A_hat (bf16)
                      + n_pad * d_pad * 2                   # X (bf16)
                      + num_layers * d_pad * d_pad * 2      # conv W (bf16)
                      + num_layers * d_pad * 4              # conv b (f32)
                      + g_pad * n_pad * 2                   # pool (bf16)
                      + d_pad * 128 * 2 + 128 * 4           # lin W/b
                      + g_pad * 128 * 4)                    # output (f32)
    return pl.CostEstimate(flops=flops, transcendentals=0,
                           bytes_accessed=bytes_accessed)


def _vmem_limit_bytes(resident_bytes):
    """Derive the Mosaic VMEM budget from actual buffer bytes + headroom,
    capped per-generation (v7x has only 64 MiB physical VMEM)."""
    want = 2 * resident_bytes + (4 << 20)       # temps / double-buffer margin
    cap = 56 << 20                              # conservative default (v7x-safe)
    try:
        info = pltpu.get_tpu_info()
        cap = int(0.85 * getattr(info, "vmem_capacity_bytes", cap))
    except Exception:
        pass
    return int(max(8 << 20, min(want, cap)))


def fused_gcn(a_pad, x_pad, w_stack, b_stack, p_pad, wl_pad, bl_pad):
    n_pad, d_pad = x_pad.shape
    g_pad = p_pad.shape[0]
    num_layers = w_stack.shape[0]

    resident = (a_pad.size * 2 + x_pad.size * 2 + w_stack.size * 2
                + b_stack.size * 4 + p_pad.size * 2 + wl_pad.size * 2
                + bl_pad.size * 4 + g_pad * 128 * 4
                + n_pad * d_pad * 2)                         # h scratch

    vmem_spec = pl.BlockSpec(memory_space=pltpu.MemorySpace.VMEM)
    return pl.pallas_call(
        fused_gcn_kernel,
        out_shape=jax.ShapeDtypeStruct((g_pad, 128), jnp.float32),
        in_specs=[vmem_spec] * 7,
        out_specs=vmem_spec,
        scratch_shapes=[pltpu.VMEM((n_pad, d_pad), jnp.bfloat16)],
        cost_estimate=_cost_estimate(n_pad, d_pad, g_pad, num_layers),
        compiler_params=pltpu.CompilerParams(
            vmem_limit_bytes=_vmem_limit_bytes(resident),
        ),
    )(a_pad, x_pad, w_stack, b_stack, p_pad, wl_pad, bl_pad)


# ------------------------------ glue (plain JAX) ----------------------------

def normalized_adjacency(edge_index, num_nodes):
    """Dense D^{-1/2} (A + I) D^{-1/2}, messages flow src -> dst (PyG GCNConv)."""
    src, dst = edge_index[0], edge_index[1]
    a = jnp.zeros((num_nodes, num_nodes), jnp.float32)
    a = a.at[dst, src].set(1.0)
    a = a + jnp.eye(num_nodes, dtype=jnp.float32)          # self-loops
    deg = a.sum(axis=1)
    d_inv_sqrt = jnp.where(deg > 0, 1.0 / jnp.sqrt(deg), 0.0)
    return d_inv_sqrt[:, None] * a * d_inv_sqrt[None, :]


def mean_pool_matrix(batch, num_graphs, num_nodes):
    """P[g, i] = 1/|graph g| if node i belongs to graph g, else 0."""
    onehot = (batch[None, :] == jnp.arange(num_graphs)[:, None]).astype(jnp.float32)
    counts = jnp.maximum(onehot.sum(axis=1, keepdims=True), 1.0)
    return onehot / counts


def _pad_to(arr, shape):
    pads = [(0, s - d) for d, s in zip(arr.shape, shape)]
    return jnp.pad(arr, pads)


def init_params(key, num_features, hidden_channels, num_layers):
    params = {"conv_w": [], "conv_b": []}
    dims_in = [num_features] + [hidden_channels] * (num_layers - 1)
    for fin in dims_in:
        key, k1 = jax.random.split(key)
        scale = 1.0 / jnp.sqrt(jnp.float32(fin))
        params["conv_w"].append(
            jax.random.uniform(k1, (fin, hidden_channels), jnp.float32, -scale, scale)
        )
        params["conv_b"].append(jnp.zeros((1, hidden_channels), jnp.float32))
    key, k2, k3 = jax.random.split(key, 3)
    scale = 1.0 / jnp.sqrt(jnp.float32(hidden_channels))
    params["lin_w"] = jax.random.uniform(
        k2, (hidden_channels, 1), jnp.float32, -scale, scale
    )
    params["lin_b"] = jax.random.uniform(k3, (1, 1), jnp.float32, -scale, scale)
    return params


def gcn_forward(params, x, edge_index, batch, num_graphs):
    n, f = x.shape
    h = params["conv_w"][0].shape[1]

    # Lane/sublane-friendly padded sizes.  Zeros never leak into real outputs:
    # padded A_hat rows/cols are zero, padded W rows/cols are zero, padded
    # pool-matrix columns are zero (zeros are exact in bf16).
    n_pad = _round_up(n, 128)
    d_pad = _round_up(max(f, h), 128)
    g_pad = _round_up(max(num_graphs, 1), 8)

    a_hat = normalized_adjacency(edge_index, n)
    a_pad = _pad_to(a_hat, (n_pad, n_pad)).astype(jnp.bfloat16)
    x_pad = _pad_to(x, (n_pad, d_pad)).astype(jnp.bfloat16)

    w_stack = jnp.stack(
        [_pad_to(w, (d_pad, d_pad)) for w in params["conv_w"]]
    ).astype(jnp.bfloat16)
    b_stack = jnp.stack([_pad_to(b, (1, d_pad)) for b in params["conv_b"]])  # f32

    pool = mean_pool_matrix(batch, num_graphs, n)
    p_pad = _pad_to(pool, (g_pad, n_pad)).astype(jnp.bfloat16)

    wl_pad = _pad_to(params["lin_w"], (d_pad, 128)).astype(jnp.bfloat16)
    bl_pad = _pad_to(params["lin_b"], (1, 128))                              # f32

    # F.dropout is the identity in eval mode.
    out_pad = fused_gcn(a_pad, x_pad, w_stack, b_stack, p_pad, wl_pad, bl_pad)
    return out_pad[:num_graphs, 0]                         # (num_graphs,)


# ---------------------------------- main ------------------------------------

if __name__ == "__main__":
    key = jax.random.PRNGKey(0)

    num_nodes = 32
    num_features = 8
    hidden_channels = 32
    num_layers = 3
    num_graphs = 2
    nodes_per_graph = num_nodes // num_graphs

    # deterministic node features
    key, kx = jax.random.split(key)
    x = jax.random.normal(kx, (num_nodes, num_features), jnp.float32)

    # deterministic graph structure: a bidirectional ring inside each graph
    src_list, dst_list = [], []
    for g in range(num_graphs):
        base = g * nodes_per_graph
        for i in range(nodes_per_graph):
            a = base + i
            b = base + (i + 1) % nodes_per_graph
            src_list += [a, b]
            dst_list += [b, a]
    edge_index = jnp.array([src_list, dst_list], dtype=jnp.int32)   # (2, E)

    batch = jnp.repeat(jnp.arange(num_graphs, dtype=jnp.int32), nodes_per_graph)

    params = init_params(key, num_features, hidden_channels, num_layers)

    out = gcn_forward(params, x, edge_index, batch, num_graphs)
    out = jax.block_until_ready(out)
    assert out.shape == (num_graphs,)
    print("KERNEL_OK")
</pallas_src>

<mosaic_0001>
module attributes {stable_mosaic.version = 11 : i64} {
  func.func @fused_gcn_kernel(%arg0: memref<128x128xbf16, #tpu.memory_space<vmem>>, %arg1: memref<128x128xbf16, #tpu.memory_space<vmem>>, %arg2: memref<3x128x128xbf16, #tpu.memory_space<vmem>>, %arg3: memref<3x1x128xf32, #tpu.memory_space<vmem>>, %arg4: memref<8x128xbf16, #tpu.memory_space<vmem>>, %arg5: memref<128x128xbf16, #tpu.memory_space<vmem>>, %arg6: memref<1x128xf32, #tpu.memory_space<vmem>>, %arg7: memref<8x128xf32, #tpu.memory_space<vmem>>, %arg8: memref<128x128xbf16, #tpu.memory_space<vmem>>) attributes {dimension_semantics = [], scalar_prefetch = 0 : i64, scratch_operands = 1 : i64, tpu.core_type = #tpu.core_type<tc>} {
    %c0 = arith.constant 0 : index
    %c0_0 = arith.constant 0 : index
    %0 = vector.load %arg1[%c0, %c0_0] : memref<128x128xbf16, #tpu.memory_space<vmem>>, vector<128x128xbf16>
    %c0_1 = arith.constant 0 : index
    %c0_2 = arith.constant 0 : index
    %c0_3 = arith.constant 0 : index
    %1 = vector.load %arg2[%c0_1, %c0_2, %c0_3] : memref<3x128x128xbf16, #tpu.memory_space<vmem>>, vector<1x128x128xbf16>
    %2 = vector.shape_cast %1 : vector<1x128x128xbf16> to vector<128x128xbf16>
    %cst = arith.constant dense<0.000000e+00> : vector<128x128xf32>
    %3 = tpu.matmul %0, %2, %cst {dimension_numbers = #tpu.dot_dimension_numbers<[1], [0], [0], [1], [0, 0, 1, 1], [], []>} : vector<128x128xbf16>, vector<128x128xbf16>, vector<128x128xf32> -> vector<128x128xf32>
    %4 = arith.truncf %3 : vector<128x128xf32> to vector<128x128xbf16>
    %c0_4 = arith.constant 0 : index
    %c0_5 = arith.constant 0 : index
    %5 = vector.load %arg0[%c0_4, %c0_5] : memref<128x128xbf16, #tpu.memory_space<vmem>>, vector<128x128xbf16>
    %cst_6 = arith.constant dense<0.000000e+00> : vector<128x128xf32>
    %6 = tpu.matmul %5, %4, %cst_6 {dimension_numbers = #tpu.dot_dimension_numbers<[1], [0], [0], [1], [0, 0, 1, 1], [], []>} : vector<128x128xbf16>, vector<128x128xbf16>, vector<128x128xf32> -> vector<128x128xf32>
    %c0_7 = arith.constant 0 : index
    %c0_8 = arith.constant 0 : index
    %c0_9 = arith.constant 0 : index
    %7 = vector.load %arg3[%c0_7, %c0_8, %c0_9] : memref<3x1x128xf32, #tpu.memory_space<vmem>>, vector<1x1x128xf32>
    %8 = vector.shape_cast %7 : vector<1x1x128xf32> to vector<1x128xf32>
    %9 = vector.broadcast %8 : vector<1x128xf32> to vector<128x128xf32>
    %10 = arith.addf %6, %9 : vector<128x128xf32>
    %cst_10 = arith.constant 0.000000e+00 : f32
    %11 = vector.broadcast %cst_10 : f32 to vector<128x128xf32>
    %12 = arith.maximumf %10, %11 : vector<128x128xf32>
    %13 = arith.truncf %12 : vector<128x128xf32> to vector<128x128xbf16>
    %c0_11 = arith.constant 0 : index
    %c0_12 = arith.constant 0 : index
    %14 = vector.load %arg8[%c0_11, %c0_12] : memref<128x128xbf16, #tpu.memory_space<vmem>>, vector<128x128xbf16>
    tpu.vector_store %arg8[%c0_11, %c0_12], %13 {strides = array<i32>} : memref<128x128xbf16, #tpu.memory_space<vmem>>, vector<128x128xbf16>,
    %c0_13 = arith.constant 0 : index
    %c0_14 = arith.constant 0 : index
    %15 = vector.load %arg8[%c0_13, %c0_14] : memref<128x128xbf16, #tpu.memory_space<vmem>>, vector<128x128xbf16>
    %c1 = arith.constant 1 : index
    %c0_15 = arith.constant 0 : index
    %c0_16 = arith.constant 0 : index
    %16 = vector.load %arg2[%c1, %c0_15, %c0_16] : memref<3x128x128xbf16, #tpu.memory_space<vmem>>, vector<1x128x128xbf16>
    %17 = vector.shape_cast %16 : vector<1x128x128xbf16> to vector<128x128xbf16>
    %cst_17 = arith.constant dense<0.000000e+00> : vector<128x128xf32>
    %18 = tpu.matmul %15, %17, %cst_17 {dimension_numbers = #tpu.dot_dimension_numbers<[1], [0], [0], [1], [0, 0, 1, 1], [], []>} : vector<128x128xbf16>, vector<128x128xbf16>, vector<128x128xf32> -> vector<128x128xf32>
    %19 = arith.truncf %18 : vector<128x128xf32> to vector<128x128xbf16>
    %c0_18 = arith.constant 0 : index
    %c0_19 = arith.constant 0 : index
    %20 = vector.load %arg0[%c0_18, %c0_19] : memref<128x128xbf16, #tpu.memory_space<vmem>>, vector<128x128xbf16>
    %cst_20 = arith.constant dense<0.000000e+00> : vector<128x128xf32>
    %21 = tpu.matmul %20, %19, %cst_20 {dimension_numbers = #tpu.dot_dimension_numbers<[1], [0], [0], [1], [0, 0, 1, 1], [], []>} : vector<128x128xbf16>, vector<128x128xbf16>, vector<128x128xf32> -> vector<128x128xf32>
    %c1_21 = arith.constant 1 : index
    %c0_22 = arith.constant 0 : index
    %c0_23 = arith.constant 0 : index
    %22 = vector.load %arg3[%c1_21, %c0_22, %c0_23] : memref<3x1x128xf32, #tpu.memory_space<vmem>>, vector<1x1x128xf32>
    %23 = vector.shape_cast %22 : vector<1x1x128xf32> to vector<1x128xf32>
    %24 = vector.broadcast %23 : vector<1x128xf32> to vector<128x128xf32>
    %25 = arith.addf %21, %24 : vector<128x128xf32>
    %cst_24 = arith.constant 0.000000e+00 : f32
    %26 = vector.broadcast %cst_24 : f32 to vector<128x128xf32>
    %27 = arith.maximumf %25, %26 : vector<128x128xf32>
    %28 = arith.truncf %27 : vector<128x128xf32> to vector<128x128xbf16>
    %c0_25 = arith.constant 0 : index
    %c0_26 = arith.constant 0 : index
    %29 = vector.load %arg8[%c0_25, %c0_26] : memref<128x128xbf16, #tpu.memory_space<vmem>>, vector<128x128xbf16>
    tpu.vector_store %arg8[%c0_25, %c0_26], %28 {strides = array<i32>} : memref<128x128xbf16, #tpu.memory_space<vmem>>, vector<128x128xbf16>,
    %c0_27 = arith.constant 0 : index
    %c0_28 = arith.constant 0 : index
    %30 = vector.load %arg8[%c0_27, %c0_28] : memref<128x128xbf16, #tpu.memory_space<vmem>>, vector<128x128xbf16>
    %c2 = arith.constant 2 : index
    %c0_29 = arith.constant 0 : index
    %c0_30 = arith.constant 0 : index
    %31 = vector.load %arg2[%c2, %c0_29, %c0_30] : memref<3x128x128xbf16, #tpu.memory_space<vmem>>, vector<1x128x128xbf16>
    %32 = vector.shape_cast %31 : vector<1x128x128xbf16> to vector<128x128xbf16>
    %cst_31 = arith.constant dense<0.000000e+00> : vector<128x128xf32>
    %33 = tpu.matmul %30, %32, %cst_31 {dimension_numbers = #tpu.dot_dimension_numbers<[1], [0], [0], [1], [0, 0, 1, 1], [], []>} : vector<128x128xbf16>, vector<128x128xbf16>, vector<128x128xf32> -> vector<128x128xf32>
    %34 = arith.truncf %33 : vector<128x128xf32> to vector<128x128xbf16>
    %c0_32 = arith.constant 0 : index
    %c0_33 = arith.constant 0 : index
    %35 = vector.load %arg0[%c0_32, %c0_33] : memref<128x128xbf16, #tpu.memory_space<vmem>>, vector<128x128xbf16>
    %cst_34 = arith.constant dense<0.000000e+00> : vector<128x128xf32>
    %36 = tpu.matmul %35, %34, %cst_34 {dimension_numbers = #tpu.dot_dimension_numbers<[1], [0], [0], [1], [0, 0, 1, 1], [], []>} : vector<128x128xbf16>, vector<128x128xbf16>, vector<128x128xf32> -> vector<128x128xf32>
    %c2_35 = arith.constant 2 : index
    %c0_36 = arith.constant 0 : index
    %c0_37 = arith.constant 0 : index
    %37 = vector.load %arg3[%c2_35, %c0_36, %c0_37] : memref<3x1x128xf32, #tpu.memory_space<vmem>>, vector<1x1x128xf32>
    %38 = vector.shape_cast %37 : vector<1x1x128xf32> to vector<1x128xf32>
    %39 = vector.broadcast %38 : vector<1x128xf32> to vector<128x128xf32>
    %40 = arith.addf %36, %39 : vector<128x128xf32>
    %cst_38 = arith.constant 0.000000e+00 : f32
    %41 = vector.broadcast %cst_38 : f32 to vector<128x128xf32>
    %42 = arith.maximumf %40, %41 : vector<128x128xf32>
    %43 = arith.truncf %42 : vector<128x128xf32> to vector<128x128xbf16>
    %c0_39 = arith.constant 0 : index
    %c0_40 = arith.constant 0 : index
    %44 = vector.load %arg8[%c0_39, %c0_40] : memref<128x128xbf16, #tpu.memory_space<vmem>>, vector<128x128xbf16>
    tpu.vector_store %arg8[%c0_39, %c0_40], %43 {strides = array<i32>} : memref<128x128xbf16, #tpu.memory_space<vmem>>, vector<128x128xbf16>,
    %c0_41 = arith.constant 0 : index
    %c0_42 = arith.constant 0 : index
    %45 = vector.load %arg4[%c0_41, %c0_42] : memref<8x128xbf16, #tpu.memory_space<vmem>>, vector<8x128xbf16>
    %c0_43 = arith.constant 0 : index
    %c0_44 = arith.constant 0 : index
    %46 = vector.load %arg8[%c0_43, %c0_44] : memref<128x128xbf16, #tpu.memory_space<vmem>>, vector<128x128xbf16>
    %cst_45 = arith.constant dense<0.000000e+00> : vector<8x128xf32>
    %47 = tpu.matmul %45, %46, %cst_45 {dimension_numbers = #tpu.dot_dimension_numbers<[1], [0], [0], [1], [0, 0, 1, 1], [], []>} : vector<8x128xbf16>, vector<128x128xbf16>, vector<8x128xf32> -> vector<8x128xf32>
    %48 = arith.truncf %47 : vector<8x128xf32> to vector<8x128xbf16>
    %c0_46 = arith.constant 0 : index
    %c0_47 = arith.constant 0 : index
    %49 = vector.load %arg5[%c0_46, %c0_47] : memref<128x128xbf16, #tpu.memory_space<vmem>>, vector<128x128xbf16>
    %cst_48 = arith.constant dense<0.000000e+00> : vector<8x128xf32>
    %50 = tpu.matmul %48, %49, %cst_48 {dimension_numbers = #tpu.dot_dimension_numbers<[1], [0], [0], [1], [0, 0, 1, 1], [], []>} : vector<8x128xbf16>, vector<128x128xbf16>, vector<8x128xf32> -> vector<8x128xf32>
    %c0_49 = arith.constant 0 : index
    %c0_50 = arith.constant 0 : index
    %51 = vector.load %arg6[%c0_49, %c0_50] : memref<1x128xf32, #tpu.memory_space<vmem>>, vector<1x128xf32>
    %52 = vector.broadcast %51 : vector<1x128xf32> to vector<8x128xf32>
    %53 = arith.addf %50, %52 : vector<8x128xf32>
    %c0_51 = arith.constant 0 : index
    %c0_52 = arith.constant 0 : index
    %54 = vector.load %arg7[%c0_51, %c0_52] : memref<8x128xf32, #tpu.memory_space<vmem>>, vector<8x128xf32>
    tpu.vector_store %arg7[%c0_51, %c0_52], %53 {strides = array<i32>} : memref<8x128xf32, #tpu.memory_space<vmem>>, vector<8x128xf32>,
    return
  }
}

</mosaic_0001>

<bundles_post_ra>
// kernel: tpu_custom_call.1
= control target key start
LH: loop header
LB: loop body
LE: loop exit
PB: predicated region body
PF: predicated region fallthrough
CT: control target
= control target key end

     0   :  { %12 = vsyncpa [#allocation4], 0  ;;  %s2840_s0 = inlined_call_operand.hbm [shape: bf16[128,128], index: 0, kind: input, shape index: {}]   ;;  %s2841_s1 = inlined_call_operand.hbm [shape: bf16[128,128], index: 1, kind: input, shape index: {}]   ;;  %s2842_s2 = inlined_call_operand.hbm [shape: bf16[3,128,128], index: 2, kind: input, shape index: {}]   ;;  %s2843_s3 = inlined_call_operand.vmem [shape: f32[3,1,128], index: 3, kind: input, shape index: {}]   ;;  %s2844_s4 = inlined_call_operand.vmem [shape: bf16[8,128], index: 4, kind: input, shape index: {}]   ;;  %s2845_s5 = inlined_call_operand.hbm [shape: bf16[128,128], index: 5, kind: input, shape index: {}]   ;;  %s2846_s6 = inlined_call_operand.vmem [shape: f32[1,128], index: 6, kind: input, shape index: {}]   ;;  %s2847_s7 = inlined_call_operand.hbm [shape: f32[8,128], index: 7, kind: output, shape index: {}]  }
   0x1   :  { %13 = vsyncpa [#allocation7], 0 }
   0x2   :  { %14 = vsyncpa [#allocation10], 0 }
   0x3   :  { %15 = vsyncpa [#allocation5], 0  ;;  %s2695_s24 = smov [#allocation6]   ;;  %s2696_s26 = smov [#allocation3]  }
   0x4   :  { %s33_s25 = sshll.u32 %s2695_s24, 4  ;;  %s21_s27 = sshll.u32 %s2696_s26, 4  ;;  %s34_s25 = int_to_ptr.vmem [resolvable:$true] %s33_s25  ;;  %s22_s27 = int_to_ptr.vmem [resolvable:$true] %s21_s27 }
   0x5   :  { %s2595_s28 = scalar_lea.vmem %s34_s25, 1024  ;;  %p2600_p1 = scmp.lt.s32.totalorder %s34_s25, %s34_s25 }
   0x6   :  { %p2596_p0 = scmp.ne.s32.totalorder %s34_s25, %s2595_s28  ;;  %p2601_p2 = scmp.lt.s32.totalorder %s2595_s28, %s2595_s28 }
   0x8   :  { %p2602_p3 = por %p2601_p2, %p2600_p1 }
   0xa   :  { %p2603_p4 = pnand %p2602_p3, %p2596_p0 }
   0xc   :  { %2606 = shalt.err (!%p2603_p4)
}
   0xd   :  { %s2697_s29 = smov 64   ;;  %s2698_s30 = smov 4  }
   0xe   :  { %39 = dma.hbm_to_vmem [thread:$0]  %s2841_s1, 1024, %s34_s25, [#allocation7], %s2697_s29, %s2697_s29, %s2698_s30  }
   0xf   :  { %s2615_s10 = scalar_lea.vmem %s22_s27, 1024  ;;  %p2620_p6 = scmp.lt.s32.totalorder %s22_s27, %s22_s27 }
  0x10   :  { %p2616_p5 = scmp.ne.s32.totalorder %s22_s27, %s2615_s10  ;;  %p2621_p7 = scmp.lt.s32.totalorder %s2615_s10, %s2615_s10 }
  0x12   :  { %p2622_p8 = por %p2621_p7, %p2620_p6 }
  0x14   :  { %p2623_p9 = pnand %p2622_p8, %p2616_p5 }
  0x16   :  { %2626 = shalt.err (!%p2623_p9)
}
  0x17   :  { %27 = dma.hbm_to_vmem [thread:$0]  %s2840_s0, 1024, %s22_s27, [#allocation4], %s2697_s29, %s2697_s29, %s2698_s30  }
  0x18   :  { %s2699_s13 = smov [#allocation8]   ;;  %s2700_s15 = smov [#allocation9]  }
  0x19   :  { %s45_s14 = sshll.u32 %s2699_s13, 4  ;;  %s61_s16 = sshll.u32 %s2700_s15, 4  ;;  %s46_s14 = int_to_ptr.vmem [resolvable:$true] %s45_s14  ;;  %s62_s16 = int_to_ptr.vmem [resolvable:$true] %s61_s16 }
  0x1a   :  { %s2635_s1 = scalar_lea.vmem %s46_s14, 3072  ;;  %p2640_p11 = scmp.lt.s32.totalorder %s46_s14, %s46_s14 }
  0x1b   :  { %p2636_p10 = scmp.ne.s32.totalorder %s46_s14, %s2635_s1  ;;  %p2641_p12 = scmp.lt.s32.totalorder %s2635_s1, %s2635_s1 }
  0x1d   :  { %p2642_p13 = por %p2641_p12, %p2640_p11 }
  0x1f   :  { %p2643_p0 = pnand %p2642_p13, %p2636_p10 }
  0x21   :  { %2646 = shalt.err (!%p2643_p0)
}
  0x22   :  { %51 = dma.hbm_to_vmem [thread:$0]  %s2842_s2, 3072, %s46_s14, [#allocation7], %s2697_s29, %s2697_s29, %s2698_s30  }
  0x23   :  { %s2655_s0 = scalar_lea.vmem %s62_s16, 1024  ;;  %p2660_p2 = scmp.lt.s32.totalorder %s62_s16, %s62_s16 }
  0x24   :  { %p2656_p1 = scmp.ne.s32.totalorder %s62_s16, %s2655_s0  ;;  %p2661_p3 = scmp.lt.s32.totalorder %s2655_s0, %s2655_s0 }
  0x26   :  { %p2662_p4 = por %p2661_p3, %p2660_p2 }
  0x28   :  { %p2663_p5 = pnand %p2662_p4, %p2656_p1 }
  0x2a   :  { %2666 = shalt.err (!%p2663_p5)
}
  0x2b   :  { %67 = dma.hbm_to_vmem [thread:$0]  %s2845_s5, 1024, %s62_s16, [#allocation10], %s2697_s29, %s2697_s29, %s2698_s30  }
  0x2c   :  { %2687 = dma.done.wait [#allocation4], 1024  }
  0x2d   :  { %2688 = vsyncadd [#allocation4], 4294966272 }
  0x2e   :  { %2689 = dma.done.wait [#allocation7], 4096  }
  0x2f   :  { %2690 = vsyncadd [#allocation7], 4294963200 }
  0x30   :  { %2691 = dma.done.wait [#allocation10], 1024  }
  0x31   :  { %2692 = vsyncadd [#allocation10], 4294966272  ;;  %v2499_v0 = vld [vmem:[#allocation8 + $0x38] sm:$0xff]   ;;  %v2500_v1 = vld [vmem:[#allocation8 + $0x30] sm:$0xff]   ;;  %vm2702_vm0 = vmmov 0   ;;  %s2703_s28 = smov [#allocation11]  }
  0x32   :  { %2258 = vmatprep.subr.bf16.mxu0 %v2499_v0  ;;  %v2501_v2 = vld [vmem:[#allocation8 + $0x28] sm:$0xff]   ;;  %v2502_v3 = vld [vmem:[#allocation8 + $0x20] sm:$0xff]   ;;  %v2503_v5 = vld [vmem:[#allocation8 + $0x18] sm:$0xff]   ;;  %s1802_s29 = sshll.u32 %s2703_s28, 4  ;;  %s1803_s29 = int_to_ptr.vmem [resolvable:$true] %s1802_s29 }
  0x33   :  { %2259 = vmatpush3.bf16.msra.mxu0 %v2499_v0  ;;  %v2507_v4 = vld [vmem:[#allocation6] sm:$0xff]   ;;  %v2504_v6 = vld [vmem:[#allocation8 + $0x10] sm:$0xff]   ;;  %v2505_v7 = vld [vmem:[#allocation8 + $0x8] sm:$0xff]   ;;  %p2672_p7 = scmp.lt.s32.totalorder %s1803_s29, %s1803_s29 }
  0x34   :  { %2260 = vmatprep.subr.bf16.mxu0 %v2500_v1  ;;  %2274 = vmatprep.mubr.bf16.mxu0 %v2507_v4  ;;  %v2506_v8 = vld [vmem:[#allocation8] sm:$0xff]   ;;  %v2508_v9 = vld [vmem:[#allocation6 + $0x8] sm:$0xff]   ;;  %v2509_v10 = vld [vmem:[#allocation6 + $0x10] sm:$0xff]  }
  0x35   :  { %v2510_v11 = vld [vmem:[#allocation6 + $0x18] sm:$0xff]   ;;  %v2511_v12 = vld [vmem:[#allocation6 + $0x20] sm:$0xff]   ;;  %v2512_v13 = vld [vmem:[#allocation6 + $0x28] sm:$0xff]  }
  0x36   :  { %v2513_v14 = vld [vmem:[#allocation6 + $0x30] sm:$0xff]   ;;  %v2514_v15 = vld [vmem:[#allocation6 + $0x38] sm:$0xff]   ;;  %v2515_v16 = vld [vmem:[#allocation3] sm:$0xff]  }
  0x37   :  { %2261 = vmatpush3.bf16.msra.mxu0 %v2500_v1  ;;  %2306 = vmatprep.mubr.bf16.mxu1 %v2515_v16  ;;  %v2523_v17 = vld [vmem:[#allocation8 + $0x78] sm:$0xff]   ;;  %v2524_v18 = vld [vmem:[#allocation8 + $0x70] sm:$0xff]   ;;  %v2516_v43 = vld [vmem:[#allocation3 + $0x8] sm:$0xff]  }
  0x38   :  { %2262 = vmatprep.subr.bf16.mxu0 %v2501_v2  ;;  %v2517_v44 = vld [vmem:[#allocation3 + $0x10] sm:$0xff]   ;;  %v2518_v45 = vld [vmem:[#allocation3 + $0x18] sm:$0xff]   ;;  %v2519_v46 = vld [vmem:[#allocation3 + $0x20] sm:$0xff]  }
  0x39   :  { %v2520_v47 = vld [vmem:[#allocation3 + $0x28] sm:$0xff]   ;;  %v2521_v48 = vld [vmem:[#allocation3 + $0x30] sm:$0xff]   ;;  %v2522_v49 = vld [vmem:[#allocation3 + $0x38] sm:$0xff]  }
  0x3a   :  { %v2525_v50 = vld [vmem:[#allocation8 + $0x68] sm:$0xff]   ;;  %v2526_v51 = vld [vmem:[#allocation8 + $0x60] sm:$0xff]   ;;  %v2527_v52 = vld [vmem:[#allocation8 + $0x58] sm:$0xff]  }
  0x3b   :  { %2263 = vmatpush3.bf16.msra.mxu0 %v2501_v2  ;;  %v2528_v53 = vld [vmem:[#allocation8 + $0x50] sm:$0xff]   ;;  %v2529_v54 = vld [vmem:[#allocation8 + $0x48] sm:$0xff]   ;;  %v2530_v55 = vld [vmem:[#allocation8 + $0x40] sm:$0xff]  }
  0x3c   :  { %2264 = vmatprep.subr.bf16.mxu0 %v2502_v3  ;;  %v2771_v57 = vld [vmem:[%s2843_s3] ss:$0 sm:$0xff] }
  0x3f   :  { %2265 = vmatpush3.bf16.msra.mxu0 %v2502_v3 }
  0x40   :  { %2266 = vmatprep.subr.bf16.mxu0 %v2503_v5 }
  0x43   :  { %2267 = vmatpush3.bf16.msra.mxu0 %v2503_v5 }
  0x44   :  { %2268 = vmatprep.subr.bf16.mxu0 %v2504_v6 }
  0x47   :  { %2269 = vmatpush3.bf16.msra.mxu0 %v2504_v6 }
  0x48   :  { %2270 = vmatprep.subr.bf16.mxu0 %v2505_v7 }
  0x4b   :  { %2271 = vmatpush3.bf16.msra.mxu0 %v2505_v7 }
  0x4c   :  { %2272 = vmatprep.subr.bf16.mxu0 %v2506_v8 }
  0x4f   :  { %2273 = vmatpush3.bf16.msra.mxu0 %v2506_v8 }
  0x50   :  { %2322 = vmatprep.subr.bf16.mxu0 %v2523_v17 }
  0x52   :  { %2275 = vmatmul.mubr.bf16.vlgmr.msra.gmra.mxu0 %v2508_v9 }
  0x53   :  { %2278 = vmatprep.mubr.bf16.mxu0 %v2509_v10  ;;  %2323 = vmatpush3.bf16.msra.mxu0 %v2523_v17 }
  0x54   :  { %2324 = vmatprep.subr.bf16.mxu0 %v2524_v18 }
  0x57   :  { %2325 = vmatpush3.bf16.msra.mxu0 %v2524_v18 }
  0x58   :  { %2326 = vmatprep.subr.bf16.mxu0 %v2525_v50 }
  0x5a   :  { %2279 = vmatmul.mubr.bf16.gmra.mxu0 %v2510_v11 }
  0x5b   :  { %2282 = vmatprep.mubr.bf16.mxu0 %v2511_v12  ;;  %2327 = vmatpush3.bf16.msra.mxu0 %v2525_v50 }
  0x5c   :  { %2328 = vmatprep.subr.bf16.mxu0 %v2526_v51 }
  0x5f   :  { %2329 = vmatpush3.bf16.msra.mxu0 %v2526_v51 }
  0x60   :  { %2330 = vmatprep.subr.bf16.mxu0 %v2527_v52 }
  0x62   :  { %2283 = vmatmul.mubr.bf16.gmra.mxu0 %v2512_v13 }
  0x63   :  { %2286 = vmatprep.mubr.bf16.mxu0 %v2513_v14  ;;  %2331 = vmatpush3.bf16.msra.mxu0 %v2527_v52 }
  0x64   :  { %2332 = vmatprep.subr.bf16.mxu0 %v2528_v53 }
  0x67   :  { %2333 = vmatpush3.bf16.msra.mxu0 %v2528_v53 }
  0x68   :  { %2334 = vmatprep.subr.bf16.mxu0 %v2529_v54 }
  0x6a   :  { %2287 = vmatmul.mubr.bf16.gmra.mxu0 %v2514_v15 }
  0x6b   :  { %2335 = vmatpush3.bf16.msra.mxu0 %v2529_v54 }
  0x6c   :  { %2336 = vmatprep.subr.bf16.mxu0 %v2530_v55 }
  0x6f   :  { %2337 = vmatpush3.bf16.msra.mxu0 %v2530_v55 }
 0x112   :  { %v2276_v19 = vpop.f32.mrf.mxu0 }
 0x114   :  { %v245_v20 = vpop.f32.mrf.mxu0 }
 0x116   :  { %v2277_v21 = vpop.f32.mrf.mxu0 }
 0x117   :  { %v309_v41 = vpack.c.bf16 %v2277_v21, %v2276_v19 }
 0x118   :  { %v248_v22 = vpop.f32.mrf.mxu0 }
 0x119   :  { %v308_v42 = vpack.c.bf16 %v248_v22, %v245_v20 }
 0x11a   :  { %v2280_v23 = vpop.f32.mrf.mxu0 }
 0x11c   :  { %v261_v24 = vpop.f32.mrf.mxu0 }
 0x11e   :  { %v2281_v25 = vpop.f32.mrf.mxu0 }
 0x11f   :  { %v311_v39 = vpack.c.bf16 %v2281_v25, %v2280_v23 }
 0x120   :  { %v264_v26 = vpop.f32.mrf.mxu0 }
 0x121   :  { %v310_v40 = vpack.c.bf16 %v264_v26, %v261_v24 }
 0x122   :  { %v2284_v27 = vpop.f32.mrf.mxu0 }
 0x124   :  { %v277_v28 = vpop.f32.mrf.mxu0 }
 0x126   :  { %v2285_v29 = vpop.f32.mrf.mxu0 }
 0x127   :  { %v313_v37 = vpack.c.bf16 %v2285_v29, %v2284_v27 }
 0x128   :  { %v280_v30 = vpop.f32.mrf.mxu0 }
 0x129   :  { %v312_v38 = vpack.c.bf16 %v280_v30, %v277_v28 }
 0x12a   :  { %v2288_v31 = vpop.f32.mrf.mxu0 }
 0x12c   :  { %v293_v32 = vpop.f32.mrf.mxu0 }
 0x12e   :  { %v2289_v33 = vpop.f32.mrf.mxu0 }
 0x12f   :  { %v315_v34 = vpack.c.bf16 %v2289_v33, %v2288_v31 }
 0x130   :  { %v296_v35 = vpop.f32.mrf.mxu0 }
 0x131   :  { %v314_v36 = vpack.c.bf16 %v296_v35, %v293_v32  ;;  %2290 = vmatprep.subr.bf16.mxu1 %v315_v34 }
 0x132   :  { %2291 = vmatpush3.bf16.msra.mxu1 %v315_v34 }
 0x133   :  { %2292 = vmatprep.subr.bf16.mxu1 %v314_v36 }
 0x136   :  { %2293 = vmatpush3.bf16.msra.mxu1 %v314_v36 }
 0x137   :  { %2294 = vmatprep.subr.bf16.mxu1 %v313_v37 }
 0x13a   :  { %2295 = vmatpush3.bf16.msra.mxu1 %v313_v37 }
 0x13b   :  { %2296 = vmatprep.subr.bf16.mxu1 %v312_v38 }
 0x13e   :  { %2297 = vmatpush3.bf16.msra.mxu1 %v312_v38 }
 0x13f   :  { %2298 = vmatprep.subr.bf16.mxu1 %v311_v39 }
 0x142   :  { %2299 = vmatpush3.bf16.msra.mxu1 %v311_v39 }
 0x143   :  { %2300 = vmatprep.subr.bf16.mxu1 %v310_v40 }
 0x146   :  { %2301 = vmatpush3.bf16.msra.mxu1 %v310_v40 }
 0x147   :  { %2302 = vmatprep.subr.bf16.mxu1 %v309_v41 }
 0x14a   :  { %2303 = vmatpush3.bf16.msra.mxu1 %v309_v41 }
 0x14b   :  { %2304 = vmatprep.subr.bf16.mxu1 %v308_v42 }
 0x14e   :  { %2305 = vmatpush3.bf16.msra.mxu1 %v308_v42 }
 0x151   :  { %2307 = vmatmul.mubr.bf16.vlgmr.msra.gmra.mxu1 %v2516_v43 }
 0x152   :  { %2310 = vmatprep.mubr.bf16.mxu1 %v2517_v44 }
 0x159   :  { %2311 = vmatmul.mubr.bf16.gmra.mxu1 %v2518_v45 }
 0x15a   :  { %2314 = vmatprep.mubr.bf16.mxu1 %v2519_v46 }
 0x161   :  { %2315 = vmatmul.mubr.bf16.gmra.mxu1 %v2520_v47 }
 0x162   :  { %2318 = vmatprep.mubr.bf16.mxu1 %v2521_v48 }
 0x169   :  { %2319 = vmatmul.mubr.bf16.gmra.mxu1 %v2522_v49 }
 0x211   :  { %v2308_v56 = vpop.f32.mrf.mxu1 }
 0x212   :  { %v430_v59 = vadd.f32 %v2308_v56, %v2771_v57 }
 0x213   :  { %v421_v58 = vpop.f32.mrf.mxu1 }
 0x214   :  { %v422_v61 = vadd.f32 %v2771_v57, %v421_v58  ;;  %v486_v0 = vmax.f32 %v430_v59, 0.0  ;;  %v2539_v58 = vld [vmem:[#allocation3] sm:$0xff]   ;;  %v2547_v59 = vld [vmem:[#allocation8 + $0xb8] sm:$0xff]  }
 0x215   :  { %v2309_v60 = vpop.f32.mrf.mxu1  ;;  %2370 = vmatprep.mubr.bf16.mxu1 %v2539_v58  ;;  %2386 = vmatprep.subr.bf16.mxu0 %v2547_v59 }
 0x216   :  { %v433_v62 = vadd.f32 %v2309_v60, %v2771_v57  ;;  %v484_v4 = vmax.f32 %v422_v61, 0.0  ;;  %v2548_v60 = vld [vmem:[#allocation8 + $0xb0] sm:$0xff]  }
 0x217   :  { %v424_v63 = vpop.f32.mrf.mxu1 }
 0x218   :  { %v487_v1 = vmax.f32 %v433_v62, 0.0  ;;  %v425_v2 = vadd.f32 %v2771_v57, %v424_v63 }
 0x219   :  { %v2312_v3 = vpop.f32.mrf.mxu1 }
 0x21a   :  { %v2011_v5 = vpack.c.bf16 %v487_v1, %v486_v0  ;;  %v485_v6 = vmax.f32 %v425_v2, 0.0  ;;  %v446_v9 = vadd.f32 %v2312_v3, %v2771_v57 }
 0x21b   :  { %v437_v7 = vpop.f32.mrf.mxu1 }
 0x21c   :  { %2123 = vst [vmem:[#allocation2 + $0x8] sm:$0xff] %v2011_v5   ;;  %v2006_v8 = vpack.c.bf16 %v485_v6, %v484_v4  ;;  %v438_v11 = vadd.f32 %v2771_v57, %v437_v7  ;;  %v490_v14 = vmax.f32 %v446_v9, 0.0 }
 0x21d   :  { %v2313_v10 = vpop.f32.mrf.mxu1 }
 0x21e   :  { %2007 = vst [vmem:[#allocation2] sm:$0xff] %v2006_v8   ;;  %v449_v12 = vadd.f32 %v2313_v10, %v2771_v57  ;;  %v488_v18 = vmax.f32 %v438_v11, 0.0 }
 0x21f   :  { %v440_v13 = vpop.f32.mrf.mxu1 }
 0x220   :  { %v491_v15 = vmax.f32 %v449_v12, 0.0  ;;  %v441_v16 = vadd.f32 %v2771_v57, %v440_v13 }
 0x221   :  { %v2316_v17 = vpop.f32.mrf.mxu1 }
 0x222   :  { %v2021_v19 = vpack.c.bf16 %v491_v15, %v490_v14  ;;  %v489_v20 = vmax.f32 %v441_v16, 0.0  ;;  %v462_v23 = vadd.f32 %v2316_v17, %v2771_v57 }
 0x223   :  { %v453_v21 = vpop.f32.mrf.mxu1  ;;  %v2532_v28 = vld [vmem:[#allocation2 + $0x8] sm:$0xff]  }
 0x224   :  { %2125 = vst [vmem:[#allocation2 + $0x18] sm:$0xff] %v2021_v19   ;;  %v2016_v22 = vpack.c.bf16 %v489_v20, %v488_v18  ;;  %v454_v26 = vadd.f32 %v2771_v57, %v453_v21  ;;  %v494_v30 = vmax.f32 %v462_v23, 0.0  ;;  %v2540_v20 = vld [vmem:[#allocation3 + $0x8] sm:$0xff]   ;;  %v2541_v21 = vld [vmem:[#allocation3 + $0x10] sm:$0xff]   ;;  %v2543_v23 = vld [vmem:[#allocation3 + $0x20] sm:$0xff]  }
 0x225   :  { %v2317_v24 = vpop.f32.mrf.mxu1  ;;  %v2531_v25 = vld [vmem:[#allocation2] sm:$0xff]  }
 0x226   :  { %2124 = vst [vmem:[#allocation2 + $0x10] sm:$0xff] %v2016_v22   ;;  %v465_v27 = vadd.f32 %v2317_v24, %v2771_v57  ;;  %2338 = vmatprep.mubr.bf16.mxu0 %v2531_v25  ;;  %v492_v34 = vmax.f32 %v454_v26, 0.0  ;;  %v2542_v22 = vld [vmem:[#allocation3 + $0x18] sm:$0xff]   ;;  %v2544_v24 = vld [vmem:[#allocation3 + $0x28] sm:$0xff]   ;;  %v2545_v25 = vld [vmem:[#allocation3 + $0x30] sm:$0xff]  }
 0x227   :  { %v456_v29 = vpop.f32.mrf.mxu1  ;;  %2339 = vmatmul.mubr.bf16.vlgmr.msra.gmra.mxu0 %v2532_v28  ;;  %v2546_v26 = vld [vmem:[#allocation3 + $0x38] sm:$0xff]   ;;  %v2550_v28 = vld [vmem:[#allocation8 + $0xa0] sm:$0xff]  }
 0x228   :  { %v495_v31 = vmax.f32 %v465_v27, 0.0  ;;  %v457_v32 = vadd.f32 %v2771_v57, %v456_v29  ;;  %2387 = vmatpush3.bf16.msra.mxu0 %v2547_v59  ;;  %v2549_v27 = vld [vmem:[#allocation8 + $0xa8] sm:$0xff]   ;;  %v2551_v29 = vld [vmem:[#allocation8 + $0x98] sm:$0xff]  }
 0x229   :  { %v2320_v33 = vpop.f32.mrf.mxu1  ;;  %2388 = vmatprep.subr.bf16.mxu0 %v2548_v60 }
 0x22a   :  { %v2031_v35 = vpack.c.bf16 %v495_v31, %v494_v30  ;;  %v493_v36 = vmax.f32 %v457_v32, 0.0  ;;  %v478_v39 = vadd.f32 %v2320_v33, %v2771_v57  ;;  %v2552_v30 = vld [vmem:[#allocation8 + $0x90] sm:$0xff]   ;;  %v2553_v31 = vld [vmem:[#allocation8 + $0x88] sm:$0xff]   ;;  %v2554_v32 = vld [vmem:[#allocation8 + $0x80] sm:$0xff]  }
 0x22b   :  { %v469_v37 = vpop.f32.mrf.mxu1  ;;  %v2534_v44 = vld [vmem:[#allocation2 + $0x18] sm:$0xff]  }
 0x22c   :  { %2127 = vst [vmem:[#allocation2 + $0x28] sm:$0xff] %v2031_v35   ;;  %v2026_v38 = vpack.c.bf16 %v493_v36, %v492_v34  ;;  %v470_v42 = vadd.f32 %v2771_v57, %v469_v37  ;;  %v498_v46 = vmax.f32 %v478_v39, 0.0  ;;  %2389 = vmatpush3.bf16.msra.mxu0 %v2548_v60  ;;  %v2792_v34 = vld [vmem:[%s2843_s3 + $0x1] ss:$0 sm:$0xff] }
 0x22d   :  { %v2321_v40 = vpop.f32.mrf.mxu1  ;;  %v2533_v41 = vld [vmem:[#allocation2 + $0x10] sm:$0xff]   ;;  %2390 = vmatprep.subr.bf16.mxu0 %v2549_v27 }
 0x22e   :  { %2126 = vst [vmem:[#allocation2 + $0x20] sm:$0xff] %v2026_v38   ;;  %v481_v43 = vadd.f32 %v2321_v40, %v2771_v57  ;;  %2342 = vmatprep.mubr.bf16.mxu0 %v2533_v41  ;;  %v496_v49 = vmax.f32 %v470_v42, 0.0 }
 0x22f   :  { %v472_v45 = vpop.f32.mrf.mxu1  ;;  %2343 = vmatmul.mubr.bf16.gmra.mxu0 %v2534_v44 }
 0x230   :  { %v499_v47 = vmax.f32 %v481_v43, 0.0  ;;  %v473_v48 = vadd.f32 %v2771_v57, %v472_v45  ;;  %2391 = vmatpush3.bf16.msra.mxu0 %v2549_v27 }
 0x231   :  { %2392 = vmatprep.subr.bf16.mxu0 %v2550_v28 }
 0x232   :  { %v2041_v50 = vpack.c.bf16 %v499_v47, %v498_v46  ;;  %v497_v51 = vmax.f32 %v473_v48, 0.0 }
 0x233   :  { %v2536_v54 = vld [vmem:[#allocation2 + $0x28] sm:$0xff]  }
 0x234   :  { %2129 = vst [vmem:[#allocation2 + $0x38] sm:$0xff] %v2041_v50   ;;  %v2036_v52 = vpack.c.bf16 %v497_v51, %v496_v49  ;;  %2393 = vmatpush3.bf16.msra.mxu0 %v2550_v28 }
 0x235   :  { %v2535_v53 = vld [vmem:[#allocation2 + $0x20] sm:$0xff]   ;;  %2394 = vmatprep.subr.bf16.mxu0 %v2551_v29 }
 0x236   :  { %2128 = vst [vmem:[#allocation2 + $0x30] sm:$0xff] %v2036_v52   ;;  %2346 = vmatprep.mubr.bf16.mxu0 %v2535_v53 }
 0x237   :  { %2347 = vmatmul.mubr.bf16.gmra.mxu0 %v2536_v54 }
 0x238   :  { %2395 = vmatpush3.bf16.msra.mxu0 %v2551_v29 }
 0x239   :  { %2396 = vmatprep.subr.bf16.mxu0 %v2552_v30 }
 0x23b   :  { %v2538_v56 = vld [vmem:[#allocation2 + $0x38] sm:$0xff]  }
 0x23c   :  { %2397 = vmatpush3.bf16.msra.mxu0 %v2552_v30 }
 0x23d   :  { %v2537_v55 = vld [vmem:[#allocation2 + $0x30] sm:$0xff]   ;;  %2398 = vmatprep.subr.bf16.mxu0 %v2553_v31 }
 0x23e   :  { %2350 = vmatprep.mubr.bf16.mxu0 %v2537_v55 }
 0x23f   :  { %2351 = vmatmul.mubr.bf16.gmra.mxu0 %v2538_v56 }
 0x240   :  { %2399 = vmatpush3.bf16.msra.mxu0 %v2553_v31 }
 0x241   :  { %2400 = vmatprep.subr.bf16.mxu0 %v2554_v32 }
 0x244   :  { %2401 = vmatpush3.bf16.msra.mxu0 %v2554_v32 }
 0x2e7   :  { %v2340_v57 = vpop.f32.mrf.mxu0 }
 0x2e9   :  { %v743_v61 = vpop.f32.mrf.mxu0 }
 0x2eb   :  { %v2341_v62 = vpop.f32.mrf.mxu0 }
 0x2ec   :  { %v807_v18 = vpack.c.bf16 %v2341_v62, %v2340_v57 }
 0x2ed   :  { %v746_v63 = vpop.f32.mrf.mxu0 }
 0x2ee   :  { %v806_v19 = vpack.c.bf16 %v746_v63, %v743_v61 }
 0x2ef   :  { %v2344_v0 = vpop.f32.mrf.mxu0 }
 0x2f1   :  { %v759_v1 = vpop.f32.mrf.mxu0 }
 0x2f3   :  { %v2345_v2 = vpop.f32.mrf.mxu0 }
 0x2f4   :  { %v809_v16 = vpack.c.bf16 %v2345_v2, %v2344_v0 }
 0x2f5   :  { %v762_v3 = vpop.f32.mrf.mxu0 }
 0x2f6   :  { %v808_v17 = vpack.c.bf16 %v762_v3, %v759_v1 }
 0x2f7   :  { %v2348_v4 = vpop.f32.mrf.mxu0 }
 0x2f9   :  { %v775_v5 = vpop.f32.mrf.mxu0 }
 0x2fb   :  { %v2349_v6 = vpop.f32.mrf.mxu0 }
 0x2fc   :  { %v811_v14 = vpack.c.bf16 %v2349_v6, %v2348_v4 }
 0x2fd   :  { %v778_v7 = vpop.f32.mrf.mxu0 }
 0x2fe   :  { %v810_v15 = vpack.c.bf16 %v778_v7, %v775_v5 }
 0x2ff   :  { %v2352_v8 = vpop.f32.mrf.mxu0 }
 0x301   :  { %v791_v9 = vpop.f32.mrf.mxu0 }
 0x303   :  { %v2353_v10 = vpop.f32.mrf.mxu0 }
 0x304   :  { %v813_v11 = vpack.c.bf16 %v2353_v10, %v2352_v8 }
 0x305   :  { %v794_v12 = vpop.f32.mrf.mxu0 }
 0x306   :  { %v812_v13 = vpack.c.bf16 %v794_v12, %v791_v9  ;;  %2354 = vmatprep.subr.bf16.mxu1 %v813_v11 }
 0x307   :  { %2355 = vmatpush3.bf16.msra.mxu1 %v813_v11 }
 0x308   :  { %2356 = vmatprep.subr.bf16.mxu1 %v812_v13 }
 0x30b   :  { %2357 = vmatpush3.bf16.msra.mxu1 %v812_v13 }
 0x30c   :  { %2358 = vmatprep.subr.bf16.mxu1 %v811_v14 }
 0x30f   :  { %2359 = vmatpush3.bf16.msra.mxu1 %v811_v14 }
 0x310   :  { %2360 = vmatprep.subr.bf16.mxu1 %v810_v15 }
 0x313   :  { %2361 = vmatpush3.bf16.msra.mxu1 %v810_v15 }
 0x314   :  { %2362 = vmatprep.subr.bf16.mxu1 %v809_v16 }
 0x317   :  { %2363 = vmatpush3.bf16.msra.mxu1 %v809_v16 }
 0x318   :  { %2364 = vmatprep.subr.bf16.mxu1 %v808_v17 }
 0x31b   :  { %2365 = vmatpush3.bf16.msra.mxu1 %v808_v17 }
 0x31c   :  { %2366 = vmatprep.subr.bf16.mxu1 %v807_v18 }
 0x31f   :  { %2367 = vmatpush3.bf16.msra.mxu1 %v807_v18 }
 0x320   :  { %2368 = vmatprep.subr.bf16.mxu1 %v806_v19 }
 0x323   :  { %2369 = vmatpush3.bf16.msra.mxu1 %v806_v19 }
 0x326   :  { %2371 = vmatmul.mubr.bf16.vlgmr.msra.gmra.mxu1 %v2540_v20 }
 0x327   :  { %2374 = vmatprep.mubr.bf16.mxu1 %v2541_v21 }
 0x32e   :  { %2375 = vmatmul.mubr.bf16.gmra.mxu1 %v2542_v22 }
 0x32f   :  { %2378 = vmatprep.mubr.bf16.mxu1 %v2543_v23 }
 0x336   :  { %2379 = vmatmul.mubr.bf16.gmra.mxu1 %v2544_v24 }
 0x337   :  { %2382 = vmatprep.mubr.bf16.mxu1 %v2545_v25 }
 0x33e   :  { %2383 = vmatmul.mubr.bf16.gmra.mxu1 %v2546_v26 }
 0x3e6   :  { %v2372_v33 = vpop.f32.mrf.mxu1 }
 0x3e7   :  { %v929_v36 = vadd.f32 %v2372_v33, %v2792_v34 }
 0x3e8   :  { %v920_v35 = vpop.f32.mrf.mxu1 }
 0x3e9   :  { %v921_v38 = vadd.f32 %v2792_v34, %v920_v35  ;;  %v985_v41 = vmax.f32 %v929_v36, 0.0  ;;  %v2563_v35 = vld [vmem:[#allocation3] sm:$0xff]  }
 0x3ea   :  { %v2373_v37 = vpop.f32.mrf.mxu1  ;;  %2434 = vmatprep.mubr.bf16.mxu1 %v2563_v35 }
 0x3eb   :  { %v932_v39 = vadd.f32 %v2373_v37, %v2792_v34  ;;  %v983_v45 = vmax.f32 %v921_v38, 0.0 }
 0x3ec   :  { %v923_v40 = vpop.f32.mrf.mxu1 }
 0x3ed   :  { %v986_v42 = vmax.f32 %v932_v39, 0.0  ;;  %v924_v43 = vadd.f32 %v2792_v34, %v923_v40 }
 0x3ee   :  { %v2376_v44 = vpop.f32.mrf.mxu1 }
 0x3ef   :  { %v2051_v46 = vpack.c.bf16 %v986_v42, %v985_v41  ;;  %v984_v47 = vmax.f32 %v924_v43, 0.0  ;;  %v945_v50 = vadd.f32 %v2376_v44, %v2792_v34 }
 0x3f0   :  { %v936_v48 = vpop.f32.mrf.mxu1 }
 0x3f1   :  { %2130 = vst [vmem:[#allocation2 + $0x8] sm:$0xff] %v2051_v46   ;;  %v2046_v49 = vpack.c.bf16 %v984_v47, %v983_v45  ;;  %v937_v52 = vadd.f32 %v2792_v34, %v936_v48  ;;  %v989_v55 = vmax.f32 %v945_v50, 0.0 }
 0x3f2   :  { %v2377_v51 = vpop.f32.mrf.mxu1 }
 0x3f3   :  { %2047 = vst [vmem:[#allocation2] sm:$0xff] %v2046_v49   ;;  %v948_v53 = vadd.f32 %v2377_v51, %v2792_v34  ;;  %v987_v60 = vmax.f32 %v937_v52, 0.0 }
 0x3f4   :  { %v939_v54 = vpop.f32.mrf.mxu1 }
 0x3f5   :  { %v990_v56 = vmax.f32 %v948_v53, 0.0  ;;  %v940_v58 = vadd.f32 %v2792_v34, %v939_v54 }
 0x3f6   :  { %v2380_v59 = vpop.f32.mrf.mxu1 }
 0x3f7   :  { %v2061_v57 = vpack.c.bf16 %v990_v56, %v989_v55  ;;  %v988_v61 = vmax.f32 %v940_v58, 0.0  ;;  %v961_v0 = vadd.f32 %v2380_v59, %v2792_v34 }
 0x3f8   :  { %v952_v62 = vpop.f32.mrf.mxu1  ;;  %v2556_v5 = vld [vmem:[#allocation2 + $0x8] sm:$0xff]  }
 0x3f9   :  { %2132 = vst [vmem:[#allocation2 + $0x18] sm:$0xff] %v2061_v57   ;;  %v2056_v63 = vpack.c.bf16 %v988_v61, %v987_v60  ;;  %v953_v3 = vadd.f32 %v2792_v34, %v952_v62  ;;  %v993_v7 = vmax.f32 %v961_v0, 0.0  ;;  %v2564_v60 = vld [vmem:[#allocation3 + $0x8] sm:$0xff]   ;;  %v2565_v57 = vld [vmem:[#allocation3 + $0x10] sm:$0xff]   ;;  %v2566_v61 = vld [vmem:[#allocation3 + $0x18] sm:$0xff]  }
 0x3fa   :  { %v2381_v1 = vpop.f32.mrf.mxu1  ;;  %v2555_v2 = vld [vmem:[#allocation2] sm:$0xff]   ;;  %v2569_v0 = vld [vmem:[#allocation3 + $0x30] sm:$0xff]  }
 0x3fb   :  { %2131 = vst [vmem:[#allocation2 + $0x10] sm:$0xff] %v2056_v63   ;;  %v964_v4 = vadd.f32 %v2381_v1, %v2792_v34  ;;  %2402 = vmatprep.mubr.bf16.mxu0 %v2555_v2  ;;  %v991_v11 = vmax.f32 %v953_v3, 0.0  ;;  %v2567_v62 = vld [vmem:[#allocation3 + $0x20] sm:$0xff]   ;;  %v2568_v63 = vld [vmem:[#allocation3 + $0x28] sm:$0xff]   ;;  %v2570_v1 = vld [vmem:[#allocation3 + $0x38] sm:$0xff]   ;;  %v2701_v2 = vmov 0.0  }
 0x3fc   :  { %v955_v6 = vpop.f32.mrf.mxu1  ;;  %2403 = vmatmul.mubr.bf16.vlgmr.msra.gmra.mxu0 %v2556_v5  ;;  %2450 = vmatprep.subr.bf16.mxu0 %v2701_v2  ;;  %v2579_v3 = vld [vmem:[#allocation9 + $0x38] sm:$0xff]   ;;  %v2581_v5 = vld [vmem:[#allocation9 + $0x28] sm:$0xff]  }
 0x3fd   :  { %v994_v8 = vmax.f32 %v964_v4, 0.0  ;;  %v956_v9 = vadd.f32 %v2792_v34, %v955_v6  ;;  %v2580_v4 = vld [vmem:[#allocation9 + $0x30] sm:$0xff]   ;;  %v2582_v6 = vld [vmem:[#allocation9 + $0x20] sm:$0xff]  }
 0x3fe   :  { %v2384_v10 = vpop.f32.mrf.mxu1 }
 0x3ff   :  { %v2071_v12 = vpack.c.bf16 %v994_v8, %v993_v7  ;;  %v992_v13 = vmax.f32 %v956_v9, 0.0  ;;  %v977_v16 = vadd.f32 %v2384_v10, %v2792_v34  ;;  %v2583_v7 = vld [vmem:[#allocation9 + $0x18] sm:$0xff]   ;;  %v2584_v8 = vld [vmem:[#allocation9 + $0x10] sm:$0xff]   ;;  %v2585_v9 = vld [vmem:[#allocation9 + $0x8] sm:$0xff]  }
 0x400   :  { %v968_v14 = vpop.f32.mrf.mxu1  ;;  %v2558_v21 = vld [vmem:[#allocation2 + $0x18] sm:$0xff]  }
 0x401   :  { %2134 = vst [vmem:[#allocation2 + $0x28] sm:$0xff] %v2071_v12   ;;  %v2066_v15 = vpack.c.bf16 %v992_v13, %v991_v11  ;;  %v969_v19 = vadd.f32 %v2792_v34, %v968_v14  ;;  %v997_v23 = vmax.f32 %v977_v16, 0.0  ;;  %v1913_v11 = vld [vmem:[%s2843_s3 + $0x2] ss:$0 sm:$0xff] }
 0x402   :  { %v2385_v17 = vpop.f32.mrf.mxu1  ;;  %v2557_v18 = vld [vmem:[#allocation2 + $0x10] sm:$0xff]  }
 0x403   :  { %2133 = vst [vmem:[#allocation2 + $0x20] sm:$0xff] %v2066_v15   ;;  %v980_v20 = vadd.f32 %v2385_v17, %v2792_v34  ;;  %2406 = vmatprep.mubr.bf16.mxu0 %v2557_v18  ;;  %v995_v26 = vmax.f32 %v969_v19, 0.0 }
 0x404   :  { %v971_v22 = vpop.f32.mrf.mxu1  ;;  %2407 = vmatmul.mubr.bf16.gmra.mxu0 %v2558_v21 }
 0x405   :  { %v998_v24 = vmax.f32 %v980_v20, 0.0  ;;  %v972_v25 = vadd.f32 %v2792_v34, %v971_v22 }
 0x407   :  { %v2081_v27 = vpack.c.bf16 %v998_v24, %v997_v23  ;;  %v996_v28 = vmax.f32 %v972_v25, 0.0 }
 0x408   :  { %v2560_v31 = vld [vmem:[#allocation2 + $0x28] sm:$0xff]  }
 0x409   :  { %2136 = vst [vmem:[#allocation2 + $0x38] sm:$0xff] %v2081_v27   ;;  %v2076_v29 = vpack.c.bf16 %v996_v28, %v995_v26 }
 0x40a   :  { %v2559_v30 = vld [vmem:[#allocation2 + $0x20] sm:$0xff]  }
 0x40b   :  { %2135 = vst [vmem:[#allocation2 + $0x30] sm:$0xff] %v2076_v29   ;;  %2410 = vmatprep.mubr.bf16.mxu0 %v2559_v30 }
 0x40c   :  { %2411 = vmatmul.mubr.bf16.gmra.mxu0 %v2560_v31 }
 0x410   :  { %v2562_v33 = vld [vmem:[#allocation2 + $0x38] sm:$0xff]  }
 0x412   :  { %v2561_v32 = vld [vmem:[#allocation2 + $0x30] sm:$0xff]  }
 0x413   :  { %2414 = vmatprep.mubr.bf16.mxu0 %v2561_v32 }
 0x414   :  { %2415 = vmatmul.mubr.bf16.gmra.mxu0 %v2562_v33 }
 0x415   :  { %2466 = vmatprep.mubr.msk.bf16.mxu0 %vm2702_vm0, %v2701_v2 }
 0x4bc   :  { %v2404_v36 = vpop.f32.mrf.mxu0 }
 0x4be   :  { %v1242_v37 = vpop.f32.mrf.mxu0 }
 0x4c0   :  { %v2405_v34 = vpop.f32.mrf.mxu0 }
 0x4c1   :  { %v1306_v58 = vpack.c.bf16 %v2405_v34, %v2404_v36 }
 0x4c2   :  { %v1245_v38 = vpop.f32.mrf.mxu0 }
 0x4c3   :  { %v1305_v59 = vpack.c.bf16 %v1245_v38, %v1242_v37 }
 0x4c4   :  { %v2408_v39 = vpop.f32.mrf.mxu0 }
 0x4c6   :  { %v1258_v40 = vpop.f32.mrf.mxu0 }
 0x4c8   :  { %v2409_v41 = vpop.f32.mrf.mxu0 }
 0x4c9   :  { %v1308_v55 = vpack.c.bf16 %v2409_v41, %v2408_v39 }
 0x4ca   :  { %v1261_v42 = vpop.f32.mrf.mxu0 }
 0x4cb   :  { %v1307_v56 = vpack.c.bf16 %v1261_v42, %v1258_v40 }
 0x4cc   :  { %v2412_v43 = vpop.f32.mrf.mxu0 }
 0x4ce   :  { %v1274_v44 = vpop.f32.mrf.mxu0 }
 0x4d0   :  { %v2413_v45 = vpop.f32.mrf.mxu0 }
 0x4d1   :  { %v1310_v53 = vpack.c.bf16 %v2413_v45, %v2412_v43 }
 0x4d2   :  { %v1277_v46 = vpop.f32.mrf.mxu0 }
 0x4d3   :  { %v1309_v54 = vpack.c.bf16 %v1277_v46, %v1274_v44 }
 0x4d4   :  { %v2416_v47 = vpop.f32.mrf.mxu0 }
 0x4d6   :  { %v1290_v48 = vpop.f32.mrf.mxu0 }
 0x4d8   :  { %v2417_v49 = vpop.f32.mrf.mxu0 }
 0x4d9   :  { %v1312_v50 = vpack.c.bf16 %v2417_v49, %v2416_v47 }
 0x4da   :  { %v1293_v51 = vpop.f32.mrf.mxu0 }
 0x4db   :  { %v1311_v52 = vpack.c.bf16 %v1293_v51, %v1290_v48  ;;  %2418 = vmatprep.subr.bf16.mxu1 %v1312_v50 }
 0x4dc   :  { %2419 = vmatpush3.bf16.msra.mxu1 %v1312_v50 }
 0x4dd   :  { %2420 = vmatprep.subr.bf16.mxu1 %v1311_v52 }
 0x4e0   :  { %2421 = vmatpush3.bf16.msra.mxu1 %v1311_v52 }
 0x4e1   :  { %2422 = vmatprep.subr.bf16.mxu1 %v1310_v53 }
 0x4e4   :  { %2423 = vmatpush3.bf16.msra.mxu1 %v1310_v53 }
 0x4e5   :  { %2424 = vmatprep.subr.bf16.mxu1 %v1309_v54 }
 0x4e8   :  { %2425 = vmatpush3.bf16.msra.mxu1 %v1309_v54 }
 0x4e9   :  { %2426 = vmatprep.subr.bf16.mxu1 %v1308_v55 }
 0x4ec   :  { %2427 = vmatpush3.bf16.msra.mxu1 %v1308_v55 }
 0x4ed   :  { %2428 = vmatprep.subr.bf16.mxu1 %v1307_v56 }
 0x4f0   :  { %2429 = vmatpush3.bf16.msra.mxu1 %v1307_v56 }
 0x4f1   :  { %2430 = vmatprep.subr.bf16.mxu1 %v1306_v58 }
 0x4f4   :  { %2431 = vmatpush3.bf16.msra.mxu1 %v1306_v58 }
 0x4f5   :  { %2432 = vmatprep.subr.bf16.mxu1 %v1305_v59 }
 0x4f8   :  { %2433 = vmatpush3.bf16.msra.mxu1 %v1305_v59 }
 0x4f9   :  { %2470 = vmatprep.subr.bf16.mxu1 %v2701_v2 }
 0x4fb   :  { %2435 = vmatmul.mubr.bf16.vlgmr.msra.gmra.mxu1 %v2564_v60 }
 0x4fc   :  { %2438 = vmatprep.mubr.bf16.mxu1 %v2565_v57  ;;  %2471 = vmatpush3.bf16.msra.mxu1 %v2579_v3 }
 0x4fd   :  { %2472 = vmatprep.subr.bf16.mxu1 %v2701_v2 }
 0x500   :  { %2473 = vmatpush3.bf16.msra.mxu1 %v2580_v4 }
 0x501   :  { %2474 = vmatprep.subr.bf16.mxu1 %v2701_v2 }
 0x503   :  { %2439 = vmatmul.mubr.bf16.gmra.mxu1 %v2566_v61 }
 0x504   :  { %2442 = vmatprep.mubr.bf16.mxu1 %v2567_v62  ;;  %2475 = vmatpush3.bf16.msra.mxu1 %v2581_v5 }
 0x505   :  { %2476 = vmatprep.subr.bf16.mxu1 %v2701_v2 }
 0x508   :  { %2477 = vmatpush3.bf16.msra.mxu1 %v2582_v6 }
 0x509   :  { %2478 = vmatprep.subr.bf16.mxu1 %v2701_v2 }
 0x50b   :  { %2443 = vmatmul.mubr.bf16.gmra.mxu1 %v2568_v63 }
 0x50c   :  { %2446 = vmatprep.mubr.bf16.mxu1 %v2569_v0  ;;  %2479 = vmatpush3.bf16.msra.mxu1 %v2583_v7 }
 0x50d   :  { %2480 = vmatprep.subr.bf16.mxu1 %v2701_v2 }
 0x510   :  { %2481 = vmatpush3.bf16.msra.mxu1 %v2584_v8 }
 0x511   :  { %2482 = vmatprep.subr.bf16.mxu1 %v2701_v2 }
 0x513   :  { %2447 = vmatmul.mubr.bf16.gmra.mxu1 %v2570_v1 }
 0x514   :  { %2486 = vmatprep.mubr.msk.bf16.mxu1 %vm2702_vm0, %v2701_v2  ;;  %2483 = vmatpush3.bf16.msra.mxu1 %v2585_v9 }
 0x515   :  { %2484 = vmatprep.subr.bf16.mxu1 %v2701_v2 }
 0x5bb   :  { %v2436_v10 = vpop.f32.mrf.mxu1 }
 0x5bc   :  { %v1428_v13 = vadd.f32 %v2436_v10, %v1913_v11 }
 0x5bd   :  { %v1419_v12 = vpop.f32.mrf.mxu1 }
 0x5be   :  { %v1420_v15 = vadd.f32 %v1913_v11, %v1419_v12  ;;  %v1484_v18 = vmax.f32 %v1428_v13, 0.0  ;;  %v1578_v12 = vld [vmem:[%s2844_s4] sm:$0xf]  ;;  %s2667_s4 = scalar_lea.vmem %s1803_s29, 128 }
 0x5bf   :  { %v2437_v14 = vpop.f32.mrf.mxu1  ;;  %v2586_v13 = vld [vmem:[#allocation9] sm:$0xff]   ;;  %p2668_p6 = scmp.ne.s32.totalorder %s1803_s29, %s2667_s4  ;;  %p2673_p8 = scmp.lt.s32.totalorder %s2667_s4, %s2667_s4 }
 0x5c0   :  { %v1431_v16 = vadd.f32 %v2437_v14, %v1913_v11  ;;  %v1482_v22 = vmax.f32 %v1420_v15, 0.0  ;;  %2485 = vmatpush3.bf16.msra.mxu1 %v2586_v13 }
 0x5c1   :  { %v1422_v17 = vpop.f32.mrf.mxu1  ;;  %p2674_p9 = por %p2673_p8, %p2672_p7 }
 0x5c2   :  { %v1485_v19 = vmax.f32 %v1431_v16, 0.0  ;;  %v1423_v20 = vadd.f32 %v1913_v11, %v1422_v17 }
 0x5c3   :  { %v2440_v21 = vpop.f32.mrf.mxu1  ;;  %p2675_p10 = pnand %p2674_p9, %p2668_p6 }
 0x5c4   :  { %v2091_v23 = vpack.c.bf16 %v1485_v19, %v1484_v18  ;;  %v1483_v24 = vmax.f32 %v1423_v20, 0.0  ;;  %v1444_v27 = vadd.f32 %v2440_v21, %v1913_v11  ;;  %v1946_v19 = vld [vmem:[%s2846_s6] ss:$0 sm:$0xff] }
 0x5c5   :  { %v1435_v25 = vpop.f32.mrf.mxu1 }
 0x5c6   :  { %2137 = vst [vmem:[#allocation2 + $0x8] sm:$0xff] %v2091_v23   ;;  %v2086_v26 = vpack.c.bf16 %v1483_v24, %v1482_v22  ;;  %v1436_v29 = vadd.f32 %v1913_v11, %v1435_v25  ;;  %v1488_v32 = vmax.f32 %v1444_v27, 0.0 }
 0x5c7   :  { %v2441_v28 = vpop.f32.mrf.mxu1 }
 0x5c8   :  { %2087 = vst [vmem:[#allocation2] sm:$0xff] %v2086_v26   ;;  %v1447_v30 = vadd.f32 %v2441_v28, %v1913_v11  ;;  %v1486_v37 = vmax.f32 %v1436_v29, 0.0 }
 0x5c9   :  { %v1438_v31 = vpop.f32.mrf.mxu1 }
 0x5ca   :  { %v1489_v33 = vmax.f32 %v1447_v30, 0.0  ;;  %v1439_v35 = vadd.f32 %v1913_v11, %v1438_v31 }
 0x5cb   :  { %v2444_v36 = vpop.f32.mrf.mxu1 }
 0x5cc   :  { %v2101_v34 = vpack.c.bf16 %v1489_v33, %v1488_v32  ;;  %v1487_v38 = vmax.f32 %v1439_v35, 0.0  ;;  %v1460_v41 = vadd.f32 %v2444_v36, %v1913_v11 }
 0x5cd   :  { %v1451_v39 = vpop.f32.mrf.mxu1  ;;  %v2577_v10 = vld [vmem:[#allocation2 + $0x8] sm:$0xff]  }
 0x5ce   :  { %2139 = vst [vmem:[#allocation2 + $0x18] sm:$0xff] %v2101_v34   ;;  %v2096_v40 = vpack.c.bf16 %v1487_v38, %v1486_v37  ;;  %v1452_v43 = vadd.f32 %v1913_v11, %v1451_v39  ;;  %v1492_v46 = vmax.f32 %v1460_v41, 0.0 }
 0x5cf   :  { %v2445_v42 = vpop.f32.mrf.mxu1 }
 0x5d0   :  { %2138 = vst [vmem:[#allocation2 + $0x10] sm:$0xff] %v2096_v40   ;;  %v1463_v44 = vadd.f32 %v2445_v42, %v1913_v11  ;;  %v1490_v50 = vmax.f32 %v1452_v43, 0.0 }
 0x5d1   :  { %v1454_v45 = vpop.f32.mrf.mxu1 }
 0x5d2   :  { %v1493_v47 = vmax.f32 %v1463_v44, 0.0  ;;  %v1455_v48 = vadd.f32 %v1913_v11, %v1454_v45 }
 0x5d3   :  { %v2448_v49 = vpop.f32.mrf.mxu1 }
 0x5d4   :  { %v2111_v51 = vpack.c.bf16 %v1493_v47, %v1492_v46  ;;  %v1491_v52 = vmax.f32 %v1455_v48, 0.0  ;;  %v1476_v55 = vadd.f32 %v2448_v49, %v1913_v11 }
 0x5d5   :  { %v1467_v53 = vpop.f32.mrf.mxu1  ;;  %v2575_v8 = vld [vmem:[#allocation2 + $0x18] sm:$0xff]  }
 0x5d6   :  { %2141 = vst [vmem:[#allocation2 + $0x28] sm:$0xff] %v2111_v51   ;;  %v2106_v54 = vpack.c.bf16 %v1491_v52, %v1490_v50  ;;  %v1468_v58 = vadd.f32 %v1913_v11, %v1467_v53  ;;  %v1496_v57 = vmax.f32 %v1476_v55, 0.0 }
 0x5d7   :  { %v2449_v56 = vpop.f32.mrf.mxu1  ;;  %v2576_v9 = vld [vmem:[#allocation2 + $0x10] sm:$0xff]  }
 0x5d8   :  { %2140 = vst [vmem:[#allocation2 + $0x20] sm:$0xff] %v2106_v54   ;;  %v1479_v59 = vadd.f32 %v2449_v56, %v1913_v11  ;;  %v1494_v63 = vmax.f32 %v1468_v58, 0.0 }
 0x5d9   :  { %v1470_v60 = vpop.f32.mrf.mxu1 }
 0x5da   :  { %v1497_v61 = vmax.f32 %v1479_v59, 0.0  ;;  %v1471_v62 = vadd.f32 %v1913_v11, %v1470_v60  ;;  %v2578_v11 = vld [vmem:[#allocation2] sm:$0xff]  }
 0x5dc   :  { %v2121_v0 = vpack.c.bf16 %v1497_v61, %v1496_v57  ;;  %v1495_v1 = vmax.f32 %v1471_v62, 0.0 }
 0x5dd   :  { %v2573_v6 = vld [vmem:[#allocation2 + $0x28] sm:$0xff]  }
 0x5de   :  { %2143 = vst [vmem:[#allocation2 + $0x38] sm:$0xff] %v2121_v0   ;;  %v2116_v3 = vpack.c.bf16 %v1495_v1, %v1494_v63 }
 0x5df   :  { %v2574_v7 = vld [vmem:[#allocation2 + $0x20] sm:$0xff]  }
 0x5e0   :  { %2142 = vst [vmem:[#allocation2 + $0x30] sm:$0xff] %v2116_v3  }
 0x5e5   :  { %v2571_v4 = vld [vmem:[#allocation2 + $0x38] sm:$0xff]  }
 0x5e6   :  { %2451 = vmatpush3.bf16.msra.mxu0 %v2571_v4 }
 0x5e7   :  { %2452 = vmatprep.subr.bf16.mxu0 %v2701_v2  ;;  %v2572_v5 = vld [vmem:[#allocation2 + $0x30] sm:$0xff]  }
 0x5ea   :  { %2453 = vmatpush3.bf16.msra.mxu0 %v2572_v5 }
 0x5eb   :  { %2454 = vmatprep.subr.bf16.mxu0 %v2701_v2 }
 0x5ee   :  { %2455 = vmatpush3.bf16.msra.mxu0 %v2573_v6 }
 0x5ef   :  { %2456 = vmatprep.subr.bf16.mxu0 %v2701_v2 }
 0x5f2   :  { %2457 = vmatpush3.bf16.msra.mxu0 %v2574_v7 }
 0x5f3   :  { %2458 = vmatprep.subr.bf16.mxu0 %v2701_v2 }
 0x5f6   :  { %2459 = vmatpush3.bf16.msra.mxu0 %v2575_v8 }
 0x5f7   :  { %2460 = vmatprep.subr.bf16.mxu0 %v2701_v2 }
 0x5fa   :  { %2461 = vmatpush3.bf16.msra.mxu0 %v2576_v9 }
 0x5fb   :  { %2462 = vmatprep.subr.bf16.mxu0 %v2701_v2 }
 0x5fe   :  { %2463 = vmatpush3.bf16.msra.mxu0 %v2577_v10 }
 0x5ff   :  { %2464 = vmatprep.subr.bf16.mxu0 %v2701_v2 }
 0x602   :  { %2465 = vmatpush3.bf16.msra.mxu0 %v2578_v11 }
 0x605   :  { %2467 = vmatmul.mubr.bf16.vlgmr.msra.gmra.mxu0 %v1578_v12 }
 0x6c5   :  { %v1677_v14 = vpop.f32.mrf.mxu0 }
 0x6c6   :  { %v1683_v15 = vpack.c.bf16 %v1677_v14, %v1677_v14 }
 0x6c7   :  { %v2468_v16 = vpop.f32.mrf.mxu0 }
 0x6c8   :  { %2487 = vmatmul.mubr.bf16.vlgmr.msra.gmra.mxu1 %v1683_v15 }
 0x6c9   :  { %v1680_v17 = vpop.f32.mrf.mxu0 }
 0x6cb   :  { %v2469_v18 = vpop.f32.mrf.mxu0 }
 0x788   :  { %v1789_v2 = vpop.f32.mrf.mxu1 }
 0x789   :  { %v1790_v20 = vadd.f32 %v1946_v19, %v1789_v2 }
 0x78a   :  { %v2488_v21 = vpop.f32.mrf.mxu1 }
 0x78b   :  { %1795 = vst [vmem:[#allocation11] sm:$0xff] %v1790_v20 }
 0x78c   :  { %v1792_v22 = vpop.f32.mrf.mxu1 }
 0x78d   :  { %2678 = shalt.err (!%p2675_p10)
}
 0x78e   :  { %1805 = dma.vmem_to_hbm [thread:$0]  %s1803_s29, 128, %s2847_s7, [#allocation5]   ;;  %v2489_v23 = vpop.f32.mrf.mxu1 }
 0x78f   :  { %2693 = dma.done.wait [#allocation5], 128  }
 0x790   :  { %2694 = vsyncadd [#allocation5], 4294967168 }
 0x791   :  { %1809 = vsyncpa [#allocation4], 1 }
 0x792   :  { %1810 = vsyncpa [#allocation7], 1 }
 0x793   :  { %1811 = vsyncpa [#allocation10], 1 }
 0x794   :  { %1812 = vsyncpa [#allocation5], 1 }

</bundles_post_ra>
